<compile_context>
chip_gen: v7x
topology: tpu7x:2x2x1
jax: 0.10.0
libtpu: 0.0.40
codegen_flags: <defaults>
</compile_context>

<pallas_src>
import jax
import jax.numpy as jnp
from jax.experimental import pallas as pl
from jax.experimental.pallas import tpu as pltpu


def linear_sigmoid_kernel(x_ref, w_ref, b_ref, o_ref):
    # x_ref: (B, IN)   f32
    # w_ref: (IN, OUT) f32 (pre-transposed weight)
    # b_ref: (1, OUT)  f32
    # o_ref: (B, OUT)  f32
    acc = jnp.dot(x_ref[...], w_ref[...], preferred_element_type=jnp.float32)
    acc = acc + b_ref[...]                       # VPU vadd, broadcast over rows
    # sigmoid(z) = 1 / (1 + exp(-z)); exp + approx-reciprocal both run on EUP.
    o_ref[...] = pl.reciprocal(1.0 + jnp.exp(-acc), approx=True)


def linear_sigmoid(x, w_t, bias_row):
    """x: (B, IN) f32, w_t: (IN, OUT) f32, bias_row: (1, OUT) f32 -> (B, OUT) f32.

    w_t / bias_row are prepared once at parameter-setup time (no per-call
    transpose/concat in the wrapper).
    """
    B, IN = x.shape
    OUT = w_t.shape[1]

    cost = pl.CostEstimate(
        flops=2 * B * IN * OUT,
        transcendentals=B * OUT,
        bytes_accessed=(B * IN + IN * OUT + OUT + B * OUT) * 4,
    )

    return pl.pallas_call(
        linear_sigmoid_kernel,
        out_shape=jax.ShapeDtypeStruct((B, OUT), jnp.float32),
        in_specs=[
            pl.BlockSpec(memory_space=pltpu.MemorySpace.VMEM),
            pl.BlockSpec(memory_space=pltpu.MemorySpace.VMEM),
            pl.BlockSpec(memory_space=pltpu.MemorySpace.VMEM),
        ],
        out_specs=pl.BlockSpec(memory_space=pltpu.MemorySpace.VMEM),
        cost_estimate=cost,
    )(x, w_t, bias_row)


if __name__ == "__main__":
    key = jax.random.PRNGKey(0)
    kx, kw, kb = jax.random.split(key, 3)

    # Input: matches torch.randn(4, 16)
    x = jax.random.normal(kx, (4, 16), dtype=jnp.float32)

    # Deterministic Linear(16, 6) params (PyTorch default init style:
    # uniform(-1/sqrt(in), 1/sqrt(in))).
    in_features, out_features = 16, 6
    bound = 1.0 / jnp.sqrt(jnp.float32(in_features))
    weight = jax.random.uniform(
        kw, (out_features, in_features), dtype=jnp.float32,
        minval=-bound, maxval=bound)
    bias = jax.random.uniform(
        kb, (out_features,), dtype=jnp.float32, minval=-bound, maxval=bound)

    # Parameter prep, hoisted out of the per-call path (done once).
    w_t = jnp.asarray(weight.T)                      # (IN, OUT)
    bias_row = bias.reshape(1, out_features)         # (1, OUT)

    out = linear_sigmoid(x, w_t, bias_row)
    out = jax.block_until_ready(out)

    # Reference check against plain JAX (same math as the PyTorch module).
    # Tolerance accounts for the EUP approximate-reciprocal in the sigmoid
    # (~1e-4 relative), still far tighter than any downstream use needs.
    ref = jax.nn.sigmoid(x @ weight.T + bias)
    assert out.shape == (4, 6)
    assert jnp.allclose(out, ref, atol=2e-3, rtol=2e-3)

    print("KERNEL_OK")
</pallas_src>

<mosaic_0001>
module attributes {stable_mosaic.version = 11 : i64} {
  func.func @linear_sigmoid_kernel(%arg0: memref<4x16xf32, #tpu.memory_space<vmem>>, %arg1: memref<16x6xf32, #tpu.memory_space<vmem>>, %arg2: memref<1x6xf32, #tpu.memory_space<vmem>>, %arg3: memref<4x6xf32, #tpu.memory_space<vmem>>) attributes {dimension_semantics = [], scalar_prefetch = 0 : i64, scratch_operands = 0 : i64, tpu.core_type = #tpu.core_type<tc>} {
    %c0 = arith.constant 0 : index
    %c0_0 = arith.constant 0 : index
    %0 = vector.load %arg0[%c0, %c0_0] : memref<4x16xf32, #tpu.memory_space<vmem>>, vector<4x16xf32>
    %c0_1 = arith.constant 0 : index
    %c0_2 = arith.constant 0 : index
    %1 = vector.load %arg1[%c0_1, %c0_2] : memref<16x6xf32, #tpu.memory_space<vmem>>, vector<16x6xf32>
    %cst = arith.constant dense<0.000000e+00> : vector<4x6xf32>
    %2 = tpu.matmul %0, %1, %cst {dimension_numbers = #tpu.dot_dimension_numbers<[1], [0], [0], [1], [0, 0, 1, 1], [], []>} : vector<4x16xf32>, vector<16x6xf32>, vector<4x6xf32> -> vector<4x6xf32>
    %c0_3 = arith.constant 0 : index
    %c0_4 = arith.constant 0 : index
    %3 = vector.load %arg2[%c0_3, %c0_4] : memref<1x6xf32, #tpu.memory_space<vmem>>, vector<1x6xf32>
    %4 = vector.broadcast %3 : vector<1x6xf32> to vector<4x6xf32>
    %5 = arith.addf %2, %4 : vector<4x6xf32>
    %cst_5 = arith.constant 0.000000e+00 : f32
    %6 = vector.broadcast %cst_5 : f32 to vector<4x6xf32>
    %7 = arith.subf %6, %5 : vector<4x6xf32>
    %8 = math.exp %7 : vector<4x6xf32>
    %cst_6 = arith.constant 1.000000e+00 : f32
    %9 = vector.broadcast %cst_6 : f32 to vector<4x6xf32>
    %10 = arith.addf %9, %8 : vector<4x6xf32>
    %11 = tpu.reciprocal %10 {approx = true} : vector<4x6xf32> -> vector<4x6xf32>
    %c0_7 = arith.constant 0 : index
    %c0_8 = arith.constant 0 : index
    %12 = vector.load %arg3[%c0_7, %c0_8] : memref<4x6xf32, #tpu.memory_space<vmem>>, vector<4x6xf32>
    tpu.vector_store %arg3[%c0_7, %c0_8], %11 {strides = array<i32>} : memref<4x6xf32, #tpu.memory_space<vmem>>, vector<4x6xf32>,
    return
  }
}

</mosaic_0001>

<bundles_post_ra>
// kernel: tpu_custom_call.1
= control target key start
LH: loop header
LB: loop body
LE: loop exit
PB: predicated region body
PF: predicated region fallthrough
CT: control target
= control target key end

     0   :  { %v167_v2 = vmov 0.0|0.0   ;;  %vm168_vm0 = vmmov 0   ;;  %v169_v4 = vmov 0.0   ;;  %s215_s0 = inlined_call_operand.vmem [shape: f32[4,16], index: 0, kind: input, shape index: {}]   ;;  %s216_s1 = inlined_call_operand.vmem [shape: f32[16,6], index: 1, kind: input, shape index: {}]   ;;  %s217_s2 = inlined_call_operand.vmem [shape: f32[1,6], index: 2, kind: input, shape index: {}]   ;;  %s218_s3 = inlined_call_operand.hbm [shape: f32[4,6], index: 3, kind: output, shape index: {}]  }
   0x1   :  { %v16_v0 = vld [vmem:[%s216_s1] sm:$0xff]  ;;  %v17_v1 = vld [vmem:[%s216_s1 + $0x8] sm:$0xff]  ;;  %132 = vmatprep.subr.bf16.mxu0 %v167_v2  ;;  %129 = vmatprep.mubr.msk.f32.mxu0 %vm168_vm0, %v169_v4 }
   0x2   :  { %v133_v3 = vpack.c.bf16 %v17_v1, %v16_v0 }
   0x3   :  { %8 = vsyncpa [#allocation3], 0  ;;  %v15_v5 = vld [vmem:[%s215_s0] sm:$0xf]  ;;  %vm25_vm1 = vcmask 130048   ;;  %s170_s1 = smov [#allocation2]  }
   0x4   :  { %134 = vmatpush3.bf16.msra.mxu0 %v133_v3  ;;  %v120_v6 = vld [vmem:[%s217_s2] ss:$0 sm:$0xff]  ;;  %s112_s20 = sshll.u32 %s170_s1, 4  ;;  %vm104_vm2 = vcmask 44032   ;;  %s113_s20 = int_to_ptr.vmem [resolvable:$true] %s112_s20 }
   0x5   :  { %s143_s0 = scalar_lea.vmem %s113_s20, 64  ;;  %p148_p1 = scmp.lt.s32.totalorder %s113_s20, %s113_s20 }
   0x6   :  { %p144_p0 = scmp.ne.s32.totalorder %s113_s20, %s143_s0  ;;  %p149_p2 = scmp.lt.s32.totalorder %s143_s0, %s143_s0 }
   0x7   :  { %130 = vmatmul.mubr.msk.f32.vlgmr.msra.gmra.mrb[0].mxu0 %vm25_vm1, %v15_v5 }
   0x8   :  { %p150_p3 = por %p149_p2, %p148_p1 }
   0xa   :  { %p151_p4 = pnand %p150_p3, %p144_p0 }
  0xda   :  { %v95_v7 = vpop.f32.mrb[0].mxu0 }
  0xdb   :  { %v96_v8 = vadd.f32 %v120_v6, %v95_v7  ;;  %v131_v9 = vpop.f32.mrb[1].mxu0 }
  0xdd   :  { %v99_v10 = vsub.f32 0.0, %v96_v8 }
  0xdf   :  { %v100_v11 = vmul.f32 1.442695, %v99_v10 }
  0xe1   :  { %139 = vpow2.f32 %v100_v11 }
  0xeb   :  { %v140_v12 = vpop.eup %139 }
  0xec   :  { %v102_v13 = vadd.f32 1.0, %v140_v12 }
  0xee   :  { %141 = vrcp.f32 %v102_v13 }
  0xf8   :  { %v142_v14 = vpop.eup %141 }
  0xf9   :  { %105 = vst.msk [vmem:[#allocation2] sm:$0xf] %vm104_vm2, %v142_v14 }
  0xfa   :  { %154 = shalt.err (!%p151_p4)
}
  0xfb   :  { %s155_s22 = scalar_lea.hbm %s218_s3, 64 }
  0xfc   :  { %p156_p5 = scmp.ne.s32.totalorder %s218_s3, %s155_s22  ;;  %p159_p6 = scmp.lt.u32.totalorder %s155_s22, %s218_s3 }
  0xfe   :  { %p161_p7 = pnand %p159_p6, %p156_p5 }
 0x100   :  { %164 = shalt.err (!%p161_p7)
}
 0x101   :  { %115 = dma.vmem_to_hbm [thread:$0]  %s113_s20, 64, %s218_s3, [#allocation3]  }
 0x102   :  { %165 = dma.done.wait [#allocation3], 64  }
 0x103   :  { %166 = vsyncadd [#allocation3], 4294967232 }
 0x104   :  { %119 = vsyncpa [#allocation3], 1 }

</bundles_post_ra>
